<compile_context>
chip_gen: v6e
topology: v6e:2x2x1
jax: 0.10.0
libtpu: 0.0.40
codegen_flags: <defaults>
</compile_context>

<pallas_src>
import functools

import jax
import jax.numpy as jnp
import numpy as np
from jax.experimental import pallas as pl
from jax.experimental.pallas import tpu as pltpu


def _input_block_kernel(cols_ref, w_ref, bias_ref, o_ref, cbuf, rbuf,
                        *, M, PH, PW, OHo, OWo, bi):
    """Processes `bi` images per grid step.

    cols_ref : (bi*M, KC) bf16  im2col columns; rows grouped per image and,
                                inside each image, by conv-output parity
                                [ee | eo | oe | oo], row-major within a group.
    w_ref    : (KC, Fp)   bf16  conv weights with the BN scale folded in.
    bias_ref : (1, Fp)    f32   folded BN bias.
    o_ref    : (bi, PH, PW, Fp) pooled output (NHWC, lane-dense Fp).
    cbuf     : (PH, PW+1, Fp)   scratch for the width-direction pool shift.
    rbuf     : (PH+1, PW, Fp)   scratch for the height-direction pool shift.
    """
    Fp = o_ref.shape[-1]

    # ---- conv (MXU, bf16 x bf16 -> f32) + folded BN bias + ReLU ----
    acc = jnp.dot(cols_ref[...], w_ref[...], preferred_element_type=jnp.float32)
    y = jnp.maximum(acc + bias_ref[...], 0.0)              # (bi*M, Fp), y >= 0

    n_ee = PH * PW
    n_eo = PH * OWo
    n_oe = OHo * PW

    # Zero only the pool-padding cells of the shift scratch (y >= 0, so 0 acts
    # as the -inf pool padding).  No full-buffer fill.
    cbuf[:, 0:1, :] = jnp.zeros((PH, 1, Fp), jnp.float32)
    if OWo < PW:
        cbuf[:, 1 + OWo:, :] = jnp.zeros((PH, PW - OWo, Fp), jnp.float32)
    rbuf[0:1, :, :] = jnp.zeros((1, PW, Fp), jnp.float32)
    if OHo < PH:
        rbuf[1 + OHo:, :, :] = jnp.zeros((PH - OHo, PW, Fp), jnp.float32)

    for i in range(bi):                                    # static, small
        yi = y[i * M:(i + 1) * M]
        ee = yi[0:n_ee].reshape(PH, PW, Fp)                # even rows, even cols
        eo = yi[n_ee:n_ee + n_eo].reshape(PH, OWo, Fp)     # even rows, odd  cols
        oe = yi[n_ee + n_eo:n_ee + n_eo + n_oe].reshape(OHo, PW, Fp)
        oo = yi[n_ee + n_eo + n_oe:].reshape(OHo, OWo, Fp)

        # width pooling: output col pw covers conv cols {2pw-1, 2pw, 2pw+1}
        cbuf[:, 1:1 + OWo, :] = eo
        row_e = jnp.maximum(ee, jnp.maximum(cbuf[:, 0:PW, :],
                                            cbuf[:, 1:PW + 1, :]))
        cbuf[0:OHo, 1:1 + OWo, :] = oo
        row_o = jnp.maximum(oe, jnp.maximum(cbuf[0:OHo, 0:PW, :],
                                            cbuf[0:OHo, 1:PW + 1, :]))

        # height pooling: output row ph covers conv rows {2ph-1, 2ph, 2ph+1}
        rbuf[1:1 + OHo, :, :] = row_o
        out = jnp.maximum(row_e, jnp.maximum(rbuf[0:PH, :, :],
                                             rbuf[1:PH + 1, :, :]))
        o_ref[i] = out.astype(o_ref.dtype)                 # lane-dense store


def input_block_forward(x, w, gamma, beta, run_mean, run_var,
                        *, stride=2, padding=3, eps=1e-3):
    """x: (N, C, H, W) NCHW float32 (PyTorch convention). Returns NCHW output."""
    N, C, H, W = x.shape
    F, _, KH, KW = w.shape
    OH = (H + 2 * padding - KH) // stride + 1
    OW = (W + 2 * padding - KW) // stride + 1
    assert OH >= 2 and OW >= 2
    PH = (OH - 1) // 2 + 1
    PW = (OW - 1) // 2 + 1
    OHo, OWo = OH // 2, OW // 2
    KC = KH * KW * C
    M = OH * OW
    Fp = ((F + 127) // 128) * 128                          # lane-dense features

    # ---- glue: NCHW -> NHWC, pad, im2col, parity reorder (layout only) ----
    x_nhwc = jnp.transpose(x, (0, 2, 3, 1)).astype(jnp.float32)
    x_pad = jnp.pad(x_nhwc, ((0, 0), (padding, padding), (padding, padding), (0, 0)))
    patches = []
    for kh in range(KH):
        for kw in range(KW):
            patches.append(
                x_pad[:, kh:kh + stride * OH:stride, kw:kw + stride * OW:stride, :])
    cols = jnp.stack(patches, axis=3).reshape(N, OH, OW, KC)
    # parity blocks: (even,even), (even,odd), (odd,even), (odd,odd)
    blocks = [cols[:, rp::2, cp::2, :].reshape(N, -1, KC)
              for rp in (0, 1) for cp in (0, 1)]
    cols_p = jnp.concatenate(blocks, axis=1).reshape(N * M, KC)
    cols_p = cols_p.astype(jnp.bfloat16)                   # halve the HBM stream

    # ---- fold BN (inference) into the conv weights; bias stays separate ----
    scale = (gamma / jnp.sqrt(run_var + eps)).astype(jnp.float32)
    bias = beta.astype(jnp.float32) - run_mean.astype(jnp.float32) * scale
    w_folded = w.astype(jnp.float32) * scale[:, None, None, None]
    w2 = jnp.transpose(w_folded, (2, 3, 1, 0)).reshape(KC, F)   # im2col order
    w2 = jnp.pad(w2, ((0, 0), (0, Fp - F))).astype(jnp.bfloat16)
    bias_p = jnp.pad(bias, ((0, Fp - F),)).reshape(1, Fp)

    # ---- fold a few images per grid step when the per-image M-dim is small ----
    bi = max(1, min(N, 512 // max(M, 1)))
    while N % bi != 0:
        bi -= 1
    if (bi * M) % 8 != 0:        # keep the cols block sublane-aligned
        bi = N                   # full-array block is always legal

    kernel = functools.partial(_input_block_kernel, M=M, PH=PH, PW=PW,
                               OHo=OHo, OWo=OWo, bi=bi)

    out_nhwc = pl.pallas_call(
        kernel,
        out_shape=jax.ShapeDtypeStruct((N, PH, PW, Fp), jnp.float32),
        grid_spec=pltpu.PrefetchScalarGridSpec(
            num_scalar_prefetch=0,
            grid=(N // bi,),
            in_specs=[
                pl.BlockSpec((bi * M, KC), lambda n: (n, 0)),
                pl.BlockSpec((KC, Fp), lambda n: (0, 0)),
                pl.BlockSpec((1, Fp), lambda n: (0, 0)),
            ],
            out_specs=pl.BlockSpec((bi, PH, PW, Fp), lambda n: (n, 0, 0, 0)),
            scratch_shapes=[
                pltpu.VMEM((PH, PW + 1, Fp), jnp.float32),
                pltpu.VMEM((PH + 1, PW, Fp), jnp.float32),
            ],
        ),
        compiler_params=pltpu.CompilerParams(dimension_semantics=("parallel",)),
    )(cols_p, w2, bias_p)

    out = out_nhwc[..., :F]                                # drop lane padding
    return jnp.transpose(out, (0, 3, 1, 2))                # back to NCHW


def _reference(x, w, gamma, beta, run_mean, run_var, eps=1e-3, *, quantize=False):
    """Pure-JAX reference matching the PyTorch InputBlock (eval-mode BN).

    With quantize=True the conv operands are cast to bf16 (exactly what the
    Pallas kernel feeds the MXU), so the comparison isolates structural errors.
    """
    s = gamma / jnp.sqrt(run_var + eps)
    b = beta - run_mean * s
    wf = w * s[:, None, None, None]
    xq = x
    if quantize:
        xq = x.astype(jnp.bfloat16).astype(jnp.float32)
        wf = wf.astype(jnp.bfloat16).astype(jnp.float32)
    y = jax.lax.conv_general_dilated(
        xq, wf, window_strides=(2, 2), padding=((3, 3), (3, 3)),
        dimension_numbers=("NCHW", "OIHW", "NCHW"),
        preferred_element_type=jnp.float32,
        precision=jax.lax.Precision.HIGHEST)
    y = y + b[None, :, None, None]
    y = jnp.maximum(y, 0.0)
    y = jax.lax.reduce_window(
        y, -jnp.inf, jax.lax.max,
        window_dimensions=(1, 1, 3, 3), window_strides=(1, 1, 2, 2),
        padding=((0, 0), (0, 0), (1, 1), (1, 1)))
    return y


if __name__ == "__main__":
    # Small shapes consistent with InputBlock(num_init_features=32, in_chans=3).
    N, C, H, W = 2, 3, 32, 32
    F, KH, KW = 32, 7, 7

    key = jax.random.PRNGKey(0)
    k1, k2, k3, k4, k5, k6 = jax.random.split(key, 6)
    x = jax.random.normal(k1, (N, C, H, W), dtype=jnp.float32)
    w = jax.random.normal(k2, (F, C, KH, KW), dtype=jnp.float32) * (1.0 / np.sqrt(C * KH * KW))
    gamma = jax.random.uniform(k3, (F,), minval=0.5, maxval=1.5, dtype=jnp.float32)
    beta = jax.random.normal(k4, (F,), dtype=jnp.float32) * 0.1
    run_mean = jax.random.normal(k5, (F,), dtype=jnp.float32) * 0.1
    run_var = jax.random.uniform(k6, (F,), minval=0.5, maxval=1.5, dtype=jnp.float32)

    out = jax.block_until_ready(
        input_block_forward(x, w, gamma, beta, run_mean, run_var))
    assert out.shape == (N, F, 8, 8), out.shape

    # Tight structural check against a reference that uses the same bf16 conv
    # operands (both accumulate in f32).
    ref_q = jax.block_until_ready(
        _reference(x, w, gamma, beta, run_mean, run_var, quantize=True))
    np.testing.assert_allclose(np.asarray(out), np.asarray(ref_q),
                               rtol=2e-3, atol=2e-3)

    # Loose check against the pure-f32 PyTorch-semantics reference (bf16 matmul
    # tolerance).
    ref = jax.block_until_ready(
        _reference(x, w, gamma, beta, run_mean, run_var))
    np.testing.assert_allclose(np.asarray(out), np.asarray(ref),
                               rtol=5e-2, atol=5e-2)

    print("KERNEL_OK")
</pallas_src>

<mosaic_0001>
module attributes {stable_mosaic.version = 11 : i64} {
  func.func @_input_block_kernel(%arg0: i32, %arg1: memref<512x147xbf16, #tpu.memory_space<vmem>>, %arg2: memref<147x128xbf16, #tpu.memory_space<vmem>>, %arg3: memref<1x128xf32, #tpu.memory_space<vmem>>, %arg4: memref<2x8x8x128xf32, #tpu.memory_space<vmem>>, %arg5: memref<8x9x128xf32, #tpu.memory_space<vmem>>, %arg6: memref<9x8x128xf32, #tpu.memory_space<vmem>>) attributes {dimension_semantics = [#tpu.dimension_semantics<parallel>], iteration_bounds = array<i64: 1>, scalar_prefetch = 0 : i64, scratch_operands = 2 : i64, tpu.core_type = #tpu.core_type<tc>, window_params = [{transform_indices = @transform_0, window_bounds = array<i64: 512, 147>}, {pipeline_mode = #tpu.pipeline_mode<synchronous>, transform_indices = @transform_1, window_bounds = array<i64: 147, 128>}, {pipeline_mode = #tpu.pipeline_mode<synchronous>, transform_indices = @transform_2, window_bounds = array<i64: 1, 128>}, {transform_indices = @transform_3, window_bounds = array<i64: 2, 8, 8, 128>}]} {
    %c0 = arith.constant 0 : index
    %c0_0 = arith.constant 0 : index
    %0 = vector.load %arg1[%c0, %c0_0] : memref<512x147xbf16, #tpu.memory_space<vmem>>, vector<512x147xbf16>
    %c0_1 = arith.constant 0 : index
    %c0_2 = arith.constant 0 : index
    %1 = vector.load %arg2[%c0_1, %c0_2] : memref<147x128xbf16, #tpu.memory_space<vmem>>, vector<147x128xbf16>
    %cst = arith.constant dense<0.000000e+00> : vector<512x128xf32>
    %2 = tpu.matmul %0, %1, %cst {dimension_numbers = #tpu.dot_dimension_numbers<[1], [0], [0], [1], [0, 0, 1, 1], [], []>} : vector<512x147xbf16>, vector<147x128xbf16>, vector<512x128xf32> -> vector<512x128xf32>
    %c0_3 = arith.constant 0 : index
    %c0_4 = arith.constant 0 : index
    %3 = vector.load %arg3[%c0_3, %c0_4] : memref<1x128xf32, #tpu.memory_space<vmem>>, vector<1x128xf32>
    %4 = vector.broadcast %3 : vector<1x128xf32> to vector<512x128xf32>
    %5 = arith.addf %2, %4 : vector<512x128xf32>
    %cst_5 = arith.constant 0.000000e+00 : f32
    %6 = vector.broadcast %cst_5 : f32 to vector<512x128xf32>
    %7 = arith.maximumf %5, %6 : vector<512x128xf32>
    %cst_6 = arith.constant 0.000000e+00 : f32
    %8 = vector.broadcast %cst_6 : f32 to vector<8x1x128xf32>
    %c0_7 = arith.constant 0 : index
    %c0_8 = arith.constant 0 : index
    %c0_9 = arith.constant 0 : index
    %9 = vector.load %arg5[%c0_7, %c0_8, %c0_9] : memref<8x9x128xf32, #tpu.memory_space<vmem>>, vector<8x1x128xf32>
    tpu.vector_store %arg5[%c0_7, %c0_8, %c0_9], %8 {strides = array<i32>} : memref<8x9x128xf32, #tpu.memory_space<vmem>>, vector<8x1x128xf32>,
    %cst_10 = arith.constant 0.000000e+00 : f32
    %10 = vector.broadcast %cst_10 : f32 to vector<1x8x128xf32>
    %c0_11 = arith.constant 0 : index
    %c0_12 = arith.constant 0 : index
    %c0_13 = arith.constant 0 : index
    %11 = vector.load %arg6[%c0_11, %c0_12, %c0_13] : memref<9x8x128xf32, #tpu.memory_space<vmem>>, vector<1x8x128xf32>
    tpu.vector_store %arg6[%c0_11, %c0_12, %c0_13], %10 {strides = array<i32>} : memref<9x8x128xf32, #tpu.memory_space<vmem>>, vector<1x8x128xf32>,
    %12 = vector.extract_strided_slice %7 {offsets = [0, 0], sizes = [256, 128], strides = [1, 1]} : vector<512x128xf32> to vector<256x128xf32>
    %13 = vector.extract_strided_slice %12 {offsets = [0, 0], sizes = [64, 128], strides = [1, 1]} : vector<256x128xf32> to vector<64x128xf32>
    %14 = vector.shape_cast %13 : vector<64x128xf32> to vector<8x8x128xf32>
    %15 = vector.extract_strided_slice %12 {offsets = [64, 0], sizes = [64, 128], strides = [1, 1]} : vector<256x128xf32> to vector<64x128xf32>
    %16 = vector.shape_cast %15 : vector<64x128xf32> to vector<8x8x128xf32>
    %17 = vector.extract_strided_slice %12 {offsets = [128, 0], sizes = [64, 128], strides = [1, 1]} : vector<256x128xf32> to vector<64x128xf32>
    %18 = vector.shape_cast %17 : vector<64x128xf32> to vector<8x8x128xf32>
    %19 = vector.extract_strided_slice %12 {offsets = [192, 0], sizes = [64, 128], strides = [1, 1]} : vector<256x128xf32> to vector<64x128xf32>
    %20 = vector.shape_cast %19 : vector<64x128xf32> to vector<8x8x128xf32>
    %c0_14 = arith.constant 0 : index
    %c1 = arith.constant 1 : index
    %c0_15 = arith.constant 0 : index
    %21 = vector.load %arg5[%c0_14, %c1, %c0_15] : memref<8x9x128xf32, #tpu.memory_space<vmem>>, vector<8x8x128xf32>
    tpu.vector_store %arg5[%c0_14, %c1, %c0_15], %16 {strides = array<i32>} : memref<8x9x128xf32, #tpu.memory_space<vmem>>, vector<8x8x128xf32>,
    %c0_16 = arith.constant 0 : index
    %c0_17 = arith.constant 0 : index
    %c0_18 = arith.constant 0 : index
    %22 = vector.load %arg5[%c0_16, %c0_17, %c0_18] : memref<8x9x128xf32, #tpu.memory_space<vmem>>, vector<8x8x128xf32>
    %c0_19 = arith.constant 0 : index
    %c1_20 = arith.constant 1 : index
    %c0_21 = arith.constant 0 : index
    %23 = vector.load %arg5[%c0_19, %c1_20, %c0_21] : memref<8x9x128xf32, #tpu.memory_space<vmem>>, vector<8x8x128xf32>
    %24 = arith.maximumf %22, %23 : vector<8x8x128xf32>
    %25 = arith.maximumf %14, %24 : vector<8x8x128xf32>
    %c0_22 = arith.constant 0 : index
    %c1_23 = arith.constant 1 : index
    %c0_24 = arith.constant 0 : index
    %26 = vector.load %arg5[%c0_22, %c1_23, %c0_24] : memref<8x9x128xf32, #tpu.memory_space<vmem>>, vector<8x8x128xf32>
    tpu.vector_store %arg5[%c0_22, %c1_23, %c0_24], %20 {strides = array<i32>} : memref<8x9x128xf32, #tpu.memory_space<vmem>>, vector<8x8x128xf32>,
    %c0_25 = arith.constant 0 : index
    %c0_26 = arith.constant 0 : index
    %c0_27 = arith.constant 0 : index
    %27 = vector.load %arg5[%c0_25, %c0_26, %c0_27] : memref<8x9x128xf32, #tpu.memory_space<vmem>>, vector<8x8x128xf32>
    %c0_28 = arith.constant 0 : index
    %c1_29 = arith.constant 1 : index
    %c0_30 = arith.constant 0 : index
    %28 = vector.load %arg5[%c0_28, %c1_29, %c0_30] : memref<8x9x128xf32, #tpu.memory_space<vmem>>, vector<8x8x128xf32>
    %29 = arith.maximumf %27, %28 : vector<8x8x128xf32>
    %30 = arith.maximumf %18, %29 : vector<8x8x128xf32>
    %c1_31 = arith.constant 1 : index
    %c0_32 = arith.constant 0 : index
    %c0_33 = arith.constant 0 : index
    %31 = vector.load %arg6[%c1_31, %c0_32, %c0_33] : memref<9x8x128xf32, #tpu.memory_space<vmem>>, vector<8x8x128xf32>
    tpu.vector_store %arg6[%c1_31, %c0_32, %c0_33], %30 {strides = array<i32>} : memref<9x8x128xf32, #tpu.memory_space<vmem>>, vector<8x8x128xf32>,
    %c0_34 = arith.constant 0 : index
    %c0_35 = arith.constant 0 : index
    %c0_36 = arith.constant 0 : index
    %32 = vector.load %arg6[%c0_34, %c0_35, %c0_36] : memref<9x8x128xf32, #tpu.memory_space<vmem>>, vector<8x8x128xf32>
    %c1_37 = arith.constant 1 : index
    %c0_38 = arith.constant 0 : index
    %c0_39 = arith.constant 0 : index
    %33 = vector.load %arg6[%c1_37, %c0_38, %c0_39] : memref<9x8x128xf32, #tpu.memory_space<vmem>>, vector<8x8x128xf32>
    %34 = arith.maximumf %32, %33 : vector<8x8x128xf32>
    %35 = arith.maximumf %25, %34 : vector<8x8x128xf32>
    %c0_40 = arith.constant 0 : index
    %c0_41 = arith.constant 0 : index
    %c0_42 = arith.constant 0 : index
    %c0_43 = arith.constant 0 : index
    %36 = vector.load %arg4[%c0_40, %c0_41, %c0_42, %c0_43] : memref<2x8x8x128xf32, #tpu.memory_space<vmem>>, vector<1x8x8x128xf32>
    %37 = vector.shape_cast %36 : vector<1x8x8x128xf32> to vector<8x8x128xf32>
    %38 = vector.shape_cast %35 : vector<8x8x128xf32> to vector<1x8x8x128xf32>
    tpu.vector_store %arg4[%c0_40, %c0_41, %c0_42, %c0_43], %38 {strides = array<i32>} : memref<2x8x8x128xf32, #tpu.memory_space<vmem>>, vector<1x8x8x128xf32>,
    %39 = vector.extract_strided_slice %7 {offsets = [256, 0], sizes = [256, 128], strides = [1, 1]} : vector<512x128xf32> to vector<256x128xf32>
    %40 = vector.extract_strided_slice %39 {offsets = [0, 0], sizes = [64, 128], strides = [1, 1]} : vector<256x128xf32> to vector<64x128xf32>
    %41 = vector.shape_cast %40 : vector<64x128xf32> to vector<8x8x128xf32>
    %42 = vector.extract_strided_slice %39 {offsets = [64, 0], sizes = [64, 128], strides = [1, 1]} : vector<256x128xf32> to vector<64x128xf32>
    %43 = vector.shape_cast %42 : vector<64x128xf32> to vector<8x8x128xf32>
    %44 = vector.extract_strided_slice %39 {offsets = [128, 0], sizes = [64, 128], strides = [1, 1]} : vector<256x128xf32> to vector<64x128xf32>
    %45 = vector.shape_cast %44 : vector<64x128xf32> to vector<8x8x128xf32>
    %46 = vector.extract_strided_slice %39 {offsets = [192, 0], sizes = [64, 128], strides = [1, 1]} : vector<256x128xf32> to vector<64x128xf32>
    %47 = vector.shape_cast %46 : vector<64x128xf32> to vector<8x8x128xf32>
    %c0_44 = arith.constant 0 : index
    %c1_45 = arith.constant 1 : index
    %c0_46 = arith.constant 0 : index
    %48 = vector.load %arg5[%c0_44, %c1_45, %c0_46] : memref<8x9x128xf32, #tpu.memory_space<vmem>>, vector<8x8x128xf32>
    tpu.vector_store %arg5[%c0_44, %c1_45, %c0_46], %43 {strides = array<i32>} : memref<8x9x128xf32, #tpu.memory_space<vmem>>, vector<8x8x128xf32>,
    %c0_47 = arith.constant 0 : index
    %c0_48 = arith.constant 0 : index
    %c0_49 = arith.constant 0 : index
    %49 = vector.load %arg5[%c0_47, %c0_48, %c0_49] : memref<8x9x128xf32, #tpu.memory_space<vmem>>, vector<8x8x128xf32>
    %c0_50 = arith.constant 0 : index
    %c1_51 = arith.constant 1 : index
    %c0_52 = arith.constant 0 : index
    %50 = vector.load %arg5[%c0_50, %c1_51, %c0_52] : memref<8x9x128xf32, #tpu.memory_space<vmem>>, vector<8x8x128xf32>
    %51 = arith.maximumf %49, %50 : vector<8x8x128xf32>
    %52 = arith.maximumf %41, %51 : vector<8x8x128xf32>
    %c0_53 = arith.constant 0 : index
    %c1_54 = arith.constant 1 : index
    %c0_55 = arith.constant 0 : index
    %53 = vector.load %arg5[%c0_53, %c1_54, %c0_55] : memref<8x9x128xf32, #tpu.memory_space<vmem>>, vector<8x8x128xf32>
    tpu.vector_store %arg5[%c0_53, %c1_54, %c0_55], %47 {strides = array<i32>} : memref<8x9x128xf32, #tpu.memory_space<vmem>>, vector<8x8x128xf32>,
    %c0_56 = arith.constant 0 : index
    %c0_57 = arith.constant 0 : index
    %c0_58 = arith.constant 0 : index
    %54 = vector.load %arg5[%c0_56, %c0_57, %c0_58] : memref<8x9x128xf32, #tpu.memory_space<vmem>>, vector<8x8x128xf32>
    %c0_59 = arith.constant 0 : index
    %c1_60 = arith.constant 1 : index
    %c0_61 = arith.constant 0 : index
    %55 = vector.load %arg5[%c0_59, %c1_60, %c0_61] : memref<8x9x128xf32, #tpu.memory_space<vmem>>, vector<8x8x128xf32>
    %56 = arith.maximumf %54, %55 : vector<8x8x128xf32>
    %57 = arith.maximumf %45, %56 : vector<8x8x128xf32>
    %c1_62 = arith.constant 1 : index
    %c0_63 = arith.constant 0 : index
    %c0_64 = arith.constant 0 : index
    %58 = vector.load %arg6[%c1_62, %c0_63, %c0_64] : memref<9x8x128xf32, #tpu.memory_space<vmem>>, vector<8x8x128xf32>
    tpu.vector_store %arg6[%c1_62, %c0_63, %c0_64], %57 {strides = array<i32>} : memref<9x8x128xf32, #tpu.memory_space<vmem>>, vector<8x8x128xf32>,
    %c0_65 = arith.constant 0 : index
    %c0_66 = arith.constant 0 : index
    %c0_67 = arith.constant 0 : index
    %59 = vector.load %arg6[%c0_65, %c0_66, %c0_67] : memref<9x8x128xf32, #tpu.memory_space<vmem>>, vector<8x8x128xf32>
    %c1_68 = arith.constant 1 : index
    %c0_69 = arith.constant 0 : index
    %c0_70 = arith.constant 0 : index
    %60 = vector.load %arg6[%c1_68, %c0_69, %c0_70] : memref<9x8x128xf32, #tpu.memory_space<vmem>>, vector<8x8x128xf32>
    %61 = arith.maximumf %59, %60 : vector<8x8x128xf32>
    %62 = arith.maximumf %52, %61 : vector<8x8x128xf32>
    %c1_71 = arith.constant 1 : index
    %c0_72 = arith.constant 0 : index
    %c0_73 = arith.constant 0 : index
    %c0_74 = arith.constant 0 : index
    %63 = vector.load %arg4[%c1_71, %c0_72, %c0_73, %c0_74] : memref<2x8x8x128xf32, #tpu.memory_space<vmem>>, vector<1x8x8x128xf32>
    %64 = vector.shape_cast %63 : vector<1x8x8x128xf32> to vector<8x8x128xf32>
    %65 = vector.shape_cast %62 : vector<8x8x128xf32> to vector<1x8x8x128xf32>
    tpu.vector_store %arg4[%c1_71, %c0_72, %c0_73, %c0_74], %65 {strides = array<i32>} : memref<2x8x8x128xf32, #tpu.memory_space<vmem>>, vector<1x8x8x128xf32>,
    return
  }
  func.func @transform_0(%arg0: i32) -> (i32, i32) {
    %c0_i32 = arith.constant 0 : i32
    %c0_i32_0 = arith.constant 0 : i32
    return %arg0, %c0_i32 : i32, i32
  }
  func.func @transform_1(%arg0: i32) -> (i32, i32) {
    %c0_i32 = arith.constant 0 : i32
    %c0_i32_0 = arith.constant 0 : i32
    %c0_i32_1 = arith.constant 0 : i32
    return %c0_i32, %c0_i32_0 : i32, i32
  }
  func.func @transform_2(%arg0: i32) -> (i32, i32) {
    %c0_i32 = arith.constant 0 : i32
    %c0_i32_0 = arith.constant 0 : i32
    %c0_i32_1 = arith.constant 0 : i32
    return %c0_i32, %c0_i32_0 : i32, i32
  }
  func.func @transform_3(%arg0: i32) -> (i32, i32, i32, i32) {
    %c0_i32 = arith.constant 0 : i32
    %c0_i32_0 = arith.constant 0 : i32
    %c0_i32_1 = arith.constant 0 : i32
    %c0_i32_2 = arith.constant 0 : i32
    return %arg0, %c0_i32, %c0_i32_0, %c0_i32_1 : i32, i32, i32, i32
  }
}

</mosaic_0001>

<bundles_post_ra>
// kernel: tpu_custom_call.1
= control target key start
LH: loop header
LB: loop body
LE: loop exit
PB: predicated region body
PF: predicated region fallthrough
CT: control target
= control target key end

     0   :  { %v1452_v1 = vmov 0   ;;  %vm451_vm0 = vcmask 154624   ;;  %vm548_vm1 = vcmask 1040384   ;;  %vm549_vm2 = vcmask 1041408   ;;  %s2115_s0 = inlined_call_operand.vmem [shape: bf16[512,147], index: 0, kind: input, shape index: {}]   ;;  %s2116_s1 = inlined_call_operand.vmem [shape: bf16[147,128], index: 1, kind: input, shape index: {}]   ;;  %s2117_s2 = inlined_call_operand.vmem [shape: f32[1,128], index: 2, kind: input, shape index: {}]   ;;  %s2118_s3 = inlined_call_operand.hbm [shape: f32[2,8,8,128], index: 3, kind: output, shape index: {}]  }
   0x1   :  { %v1324_v0 = vld [vmem:[%s2116_s1 + $0x38] sm:$0xff]   ;;  %555 = vmatprep.subr.bf16.mxu0 %v1452_v1  ;;  %1298 = vmatprep.subr.bf16.mxu1 %v1452_v1  ;;  %v1325_v2 = vld [vmem:[%s2116_s1 + $0x30] sm:$0xff]   ;;  %v1326_v3 = vld [vmem:[%s2116_s1 + $0x28] sm:$0xff]   ;;  %v1453_v10 = vmov 65535  }
   0x2   :  { %556 = vmatpush1.bf16.msra.mxu0 %v1324_v0  ;;  %1308 = vmatpush1.bf16.msra.mxu1 %v1324_v0  ;;  %v1327_v4 = vld [vmem:[%s2116_s1 + $0x20] sm:$0xff]   ;;  %v1328_v7 = vld [vmem:[%s2116_s1 + $0x18] sm:$0xff]   ;;  %v1329_v8 = vld [vmem:[%s2116_s1 + $0x10] sm:$0xff]   ;;  %v550_v11 = vsel %vm548_vm1, 4294967295, %v1453_v10 }
   0x3   :  { %557 = vmatprep.subr.bf16.mxu0 %v1452_v1  ;;  %1299 = vmatprep.subr.bf16.mxu1 %v1452_v1  ;;  %v1336_v5 = vld [vmem:[%s2115_s0 + $0x4] ss:$8 sps:$4 sm:$0xff]   ;;  %v1332_v13 = vld [vmem:[%s2116_s1 + $0x48] ss:$0 sps:$4 sm:$0x33]   ;;  %v551_v14 = vsel %vm549_vm2, %v550_v11, 0 }
   0x4   :  { %1266 = vmatprep.mubr.msk.bf16.mxu0 %vm451_vm0, %v1336_v5  ;;  %v1342_v6 = vld [vmem:[%s2115_s0 + $0x104] ss:$8 sps:$4 sm:$0xff]   ;;  %v553_v15 = vand.u32 %v1332_v13, %v551_v14  ;;  %v1334_v17 = vld [vmem:[%s2115_s0] ss:$8 sps:$4 sm:$0xff]   ;;  %v1337_v19 = vld [vmem:[%s2115_s0 + $0x14] ss:$8 sps:$4 sm:$0xff]  }
   0x5   :  { %1282 = vmatprep.mubr.msk.bf16.mxu1 %vm451_vm0, %v1342_v6  ;;  %v1330_v9 = vld [vmem:[%s2116_s1 + $0x8] sm:$0xff]   ;;  %v1331_v12 = vld [vmem:[%s2116_s1] sm:$0xff]   ;;  %v1346_v20 = vld [vmem:[%s2115_s0 + $0x114] ss:$8 sps:$4 sm:$0xff]  }
   0x6   :  { %558 = vmatpush1.bf16.msra.mxu0 %v1325_v2  ;;  %1309 = vmatpush1.bf16.msra.mxu1 %v1325_v2  ;;  %v1333_v16 = vld [vmem:[%s2116_s1 + $0x40] sm:$0xff]   ;;  %v1339_v21 = vld [vmem:[%s2115_s0 + $0x10] ss:$8 sps:$4 sm:$0xff]  }
   0x7   :  { %559 = vmatprep.subr.bf16.mxu0 %v1452_v1  ;;  %1300 = vmatprep.subr.bf16.mxu1 %v1452_v1  ;;  %v1340_v18 = vld [vmem:[%s2115_s0 + $0x100] ss:$8 sps:$4 sm:$0xff]   ;;  %v1348_v22 = vld [vmem:[%s2115_s0 + $0x110] ss:$8 sps:$4 sm:$0xff]   ;;  %v1343_v23 = vld [vmem:[%s2115_s0 + $0x24] ss:$8 sps:$4 sm:$0xff]  }
   0x8   :  { %v1352_v24 = vld [vmem:[%s2115_s0 + $0x124] ss:$8 sps:$4 sm:$0xff]  }
   0xa   :  { %560 = vmatpush1.bf16.msra.mxu0 %v1326_v3  ;;  %1310 = vmatpush1.bf16.msra.mxu1 %v1326_v3 }
   0xb   :  { %561 = vmatprep.subr.bf16.mxu0 %v1452_v1  ;;  %1301 = vmatprep.subr.bf16.mxu1 %v1452_v1 }
   0xe   :  { %562 = vmatpush1.bf16.msra.mxu0 %v1327_v4  ;;  %1311 = vmatpush1.bf16.msra.mxu1 %v1327_v4 }
   0xf   :  { %563 = vmatprep.subr.bf16.mxu0 %v1452_v1  ;;  %1302 = vmatprep.subr.bf16.mxu1 %v1452_v1 }
  0x12   :  { %564 = vmatpush1.bf16.msra.mxu0 %v1328_v7  ;;  %1312 = vmatpush1.bf16.msra.mxu1 %v1328_v7 }
  0x13   :  { %565 = vmatprep.subr.bf16.mxu0 %v1452_v1  ;;  %1303 = vmatprep.subr.bf16.mxu1 %v1452_v1 }
  0x16   :  { %566 = vmatpush1.bf16.msra.mxu0 %v1329_v8  ;;  %1313 = vmatpush1.bf16.msra.mxu1 %v1329_v8 }
  0x17   :  { %567 = vmatprep.subr.bf16.mxu0 %v1452_v1  ;;  %1304 = vmatprep.subr.bf16.mxu1 %v1452_v1 }
  0x1a   :  { %568 = vmatpush1.bf16.msra.mxu0 %v1330_v9  ;;  %1314 = vmatpush1.bf16.msra.mxu1 %v1330_v9 }
  0x1b   :  { %569 = vmatprep.subr.bf16.mxu0 %v1452_v1  ;;  %1305 = vmatprep.subr.bf16.mxu1 %v1452_v1 }
  0x1e   :  { %570 = vmatpush1.bf16.msra.mxu0 %v1331_v12  ;;  %1315 = vmatpush1.bf16.msra.mxu1 %v1331_v12 }
  0x1f   :  { %583 = vmatprep.subr.bf16.mxu0 %v1452_v1  ;;  %1306 = vmatprep.subr.bf16.mxu1 %v1452_v1 }
  0x22   :  { %584 = vmatpush2.bf16.msra.mxu0 %v553_v15  ;;  %1316 = vmatpush2.bf16.msra.mxu1 %v553_v15 }
  0x23   :  { %585 = vmatprep.subr.bf16.mxu0 %v1452_v1  ;;  %1307 = vmatprep.subr.bf16.mxu1 %v1452_v1 }
  0x26   :  { %586 = vmatpush2.bf16.msra.mxu0 %v1333_v16  ;;  %1317 = vmatpush2.bf16.msra.mxu1 %v1333_v16 }
  0x29   :  { %588 = vmatmul.mubr.bf16.vlgmr.msra.gmra.mxu0 %v1334_v17  ;;  %716 = vmatmul.mubr.bf16.vlgmr.msra.gmra.mxu1 %v1340_v18 }
  0x2a   :  { %1267 = vmatprep.mubr.msk.bf16.mxu0 %vm451_vm0, %v1337_v19  ;;  %1283 = vmatprep.mubr.msk.bf16.mxu1 %vm451_vm0, %v1346_v20 }
  0x31   :  { %596 = vmatmul.mubr.bf16.gmra.mxu0 %v1339_v21  ;;  %724 = vmatmul.mubr.bf16.gmra.mxu1 %v1348_v22 }
  0x32   :  { %1268 = vmatprep.mubr.msk.bf16.mxu0 %vm451_vm0, %v1343_v23  ;;  %1284 = vmatprep.mubr.msk.bf16.mxu1 %vm451_vm0, %v1352_v24 }
  0x33   :  { %8 = vsyncpa [#allocation5], 0  ;;  %v1345_v25 = vld [vmem:[%s2115_s0 + $0x20] ss:$8 sps:$4 sm:$0xff]   ;;  %v1349_v27 = vld [vmem:[%s2115_s0 + $0x34] ss:$8 sps:$4 sm:$0xff]  }
  0x34   :  { %v1354_v26 = vld [vmem:[%s2115_s0 + $0x120] ss:$8 sps:$4 sm:$0xff]   ;;  %v1358_v28 = vld [vmem:[%s2115_s0 + $0x134] ss:$8 sps:$4 sm:$0xff]   ;;  %v1351_v29 = vld [vmem:[%s2115_s0 + $0x30] ss:$8 sps:$4 sm:$0xff]  }
  0x35   :  { %v1360_v30 = vld [vmem:[%s2115_s0 + $0x130] ss:$8 sps:$4 sm:$0xff]   ;;  %v1355_v31 = vld [vmem:[%s2115_s0 + $0x44] ss:$8 sps:$4 sm:$0xff]   ;;  %v1357_v33 = vld [vmem:[%s2115_s0 + $0x40] ss:$8 sps:$4 sm:$0xff]  }
  0x36   :  { %v1364_v32 = vld [vmem:[%s2115_s0 + $0x144] ss:$8 sps:$4 sm:$0xff]   ;;  %v1366_v34 = vld [vmem:[%s2115_s0 + $0x140] ss:$8 sps:$4 sm:$0xff]   ;;  %v1361_v35 = vld [vmem:[%s2115_s0 + $0x54] ss:$8 sps:$4 sm:$0xff]  }
  0x37   :  { %v1370_v36 = vld [vmem:[%s2115_s0 + $0x154] ss:$8 sps:$4 sm:$0xff]   ;;  %v1363_v37 = vld [vmem:[%s2115_s0 + $0x50] ss:$8 sps:$4 sm:$0xff]   ;;  %v1367_v39 = vld [vmem:[%s2115_s0 + $0x64] ss:$8 sps:$4 sm:$0xff]  }
  0x38   :  { %v1372_v38 = vld [vmem:[%s2115_s0 + $0x150] ss:$8 sps:$4 sm:$0xff]   ;;  %v1376_v40 = vld [vmem:[%s2115_s0 + $0x164] ss:$8 sps:$4 sm:$0xff]   ;;  %v1369_v41 = vld [vmem:[%s2115_s0 + $0x60] ss:$8 sps:$4 sm:$0xff]  }
  0x39   :  { %604 = vmatmul.mubr.bf16.gmra.mxu0 %v1345_v25  ;;  %732 = vmatmul.mubr.bf16.gmra.mxu1 %v1354_v26  ;;  %v1378_v42 = vld [vmem:[%s2115_s0 + $0x160] ss:$8 sps:$4 sm:$0xff]   ;;  %v1373_v43 = vld [vmem:[%s2115_s0 + $0x74] ss:$8 sps:$4 sm:$0xff]   ;;  %v1375_v45 = vld [vmem:[%s2115_s0 + $0x70] ss:$8 sps:$4 sm:$0xff]  }
  0x3a   :  { %1269 = vmatprep.mubr.msk.bf16.mxu0 %vm451_vm0, %v1349_v27  ;;  %1285 = vmatprep.mubr.msk.bf16.mxu1 %vm451_vm0, %v1358_v28  ;;  %v1382_v44 = vld [vmem:[%s2115_s0 + $0x174] ss:$8 sps:$4 sm:$0xff]   ;;  %v1384_v46 = vld [vmem:[%s2115_s0 + $0x170] ss:$8 sps:$4 sm:$0xff]   ;;  %v1379_v47 = vld [vmem:[%s2115_s0 + $0x84] ss:$8 sps:$4 sm:$0xff]  }
  0x3b   :  { %v1388_v48 = vld [vmem:[%s2115_s0 + $0x184] ss:$8 sps:$4 sm:$0xff]   ;;  %v1381_v49 = vld [vmem:[%s2115_s0 + $0x80] ss:$8 sps:$4 sm:$0xff]   ;;  %v1385_v51 = vld [vmem:[%s2115_s0 + $0x94] ss:$8 sps:$4 sm:$0xff]  }
  0x3c   :  { %v1390_v50 = vld [vmem:[%s2115_s0 + $0x180] ss:$8 sps:$4 sm:$0xff]   ;;  %v1394_v52 = vld [vmem:[%s2115_s0 + $0x194] ss:$8 sps:$4 sm:$0xff]   ;;  %v1387_v53 = vld [vmem:[%s2115_s0 + $0x90] ss:$8 sps:$4 sm:$0xff]  }
  0x3d   :  { %v1396_v54 = vld [vmem:[%s2115_s0 + $0x190] ss:$8 sps:$4 sm:$0xff]   ;;  %v1391_v55 = vld [vmem:[%s2115_s0 + $0xa4] ss:$8 sps:$4 sm:$0xff]   ;;  %v1393_v57 = vld [vmem:[%s2115_s0 + $0xa0] ss:$8 sps:$4 sm:$0xff]  }
  0x3e   :  { %v1400_v56 = vld [vmem:[%s2115_s0 + $0x1a4] ss:$8 sps:$4 sm:$0xff]   ;;  %v1402_v58 = vld [vmem:[%s2115_s0 + $0x1a0] ss:$8 sps:$4 sm:$0xff]   ;;  %v1397_v59 = vld [vmem:[%s2115_s0 + $0xb4] ss:$8 sps:$4 sm:$0xff]  }
  0x3f   :  { %v1406_v60 = vld [vmem:[%s2115_s0 + $0x1b4] ss:$8 sps:$4 sm:$0xff]   ;;  %v1399_v61 = vld [vmem:[%s2115_s0 + $0xb0] ss:$8 sps:$4 sm:$0xff]   ;;  %v1403_v63 = vld [vmem:[%s2115_s0 + $0xc4] ss:$8 sps:$4 sm:$0xff]  }
  0x40   :  { %v1408_v62 = vld [vmem:[%s2115_s0 + $0x1b0] ss:$8 sps:$4 sm:$0xff]   ;;  %v1412_v0 = vld [vmem:[%s2115_s0 + $0x1c4] ss:$8 sps:$4 sm:$0xff]   ;;  %v1405_v1 = vld [vmem:[%s2115_s0 + $0xc0] ss:$8 sps:$4 sm:$0xff]  }
  0x41   :  { %612 = vmatmul.mubr.bf16.gmra.mxu0 %v1351_v29  ;;  %740 = vmatmul.mubr.bf16.gmra.mxu1 %v1360_v30  ;;  %v1414_v2 = vld [vmem:[%s2115_s0 + $0x1c0] ss:$8 sps:$4 sm:$0xff]   ;;  %v1409_v3 = vld [vmem:[%s2115_s0 + $0xd4] ss:$8 sps:$4 sm:$0xff]   ;;  %v1411_v5 = vld [vmem:[%s2115_s0 + $0xd0] ss:$8 sps:$4 sm:$0xff]  }
  0x42   :  { %1270 = vmatprep.mubr.msk.bf16.mxu0 %vm451_vm0, %v1355_v31  ;;  %1286 = vmatprep.mubr.msk.bf16.mxu1 %vm451_vm0, %v1364_v32  ;;  %v1418_v4 = vld [vmem:[%s2115_s0 + $0x1d4] ss:$8 sps:$4 sm:$0xff]   ;;  %v1420_v6 = vld [vmem:[%s2115_s0 + $0x1d0] ss:$8 sps:$4 sm:$0xff]   ;;  %v1415_v7 = vld [vmem:[%s2115_s0 + $0xe4] ss:$8 sps:$4 sm:$0xff]  }
  0x43   :  { %v1424_v8 = vld [vmem:[%s2115_s0 + $0x1e4] ss:$8 sps:$4 sm:$0xff]   ;;  %v1454_v9 = vmov 0.0   ;;  %v1417_v10 = vld [vmem:[%s2115_s0 + $0xe0] ss:$8 sps:$4 sm:$0xff]  }
  0x44   :  { %908 = vst [vmem:[#allocation2] sm:$0x1] %v1454_v9  ;;  %909 = vst [vmem:[#allocation2 + $0x10] sm:$0x1] %v1454_v9  ;;  %v1426_v11 = vld [vmem:[%s2115_s0 + $0x1e0] ss:$8 sps:$4 sm:$0xff]  }
  0x45   :  { %910 = vst [vmem:[#allocation2 + $0x20] sm:$0x1] %v1454_v9  ;;  %911 = vst [vmem:[#allocation2 + $0x30] sm:$0x1] %v1454_v9  ;;  %v1421_v12 = vld [vmem:[%s2115_s0 + $0xf4] ss:$8 sps:$4 sm:$0xff]  }
  0x46   :  { %912 = vst [vmem:[#allocation2 + $0x40] sm:$0x1] %v1454_v9  ;;  %913 = vst [vmem:[#allocation2 + $0x50] sm:$0x1] %v1454_v9  ;;  %v1427_v13 = vld [vmem:[%s2115_s0 + $0x1f4] ss:$8 sps:$4 sm:$0xff]  }
  0x47   :  { %914 = vst [vmem:[#allocation2 + $0x60] sm:$0x1] %v1454_v9  ;;  %915 = vst [vmem:[#allocation2 + $0x70] sm:$0x1] %v1454_v9  ;;  %v1423_v14 = vld [vmem:[%s2115_s0 + $0xf0] ss:$8 sps:$4 sm:$0xff]  }
  0x48   :  { %v1429_v15 = vld [vmem:[%s2115_s0 + $0x1f0] ss:$8 sps:$4 sm:$0xff]  }
  0x49   :  { %620 = vmatmul.mubr.bf16.gmra.mxu0 %v1357_v33  ;;  %748 = vmatmul.mubr.bf16.gmra.mxu1 %v1366_v34 }
  0x4a   :  { %1271 = vmatprep.mubr.msk.bf16.mxu0 %vm451_vm0, %v1361_v35  ;;  %1287 = vmatprep.mubr.msk.bf16.mxu1 %vm451_vm0, %v1370_v36 }
  0x51   :  { %628 = vmatmul.mubr.bf16.gmra.mxu0 %v1363_v37  ;;  %756 = vmatmul.mubr.bf16.gmra.mxu1 %v1372_v38 }
  0x52   :  { %1272 = vmatprep.mubr.msk.bf16.mxu0 %vm451_vm0, %v1367_v39  ;;  %1288 = vmatprep.mubr.msk.bf16.mxu1 %vm451_vm0, %v1376_v40 }
  0x59   :  { %636 = vmatmul.mubr.bf16.gmra.mxu0 %v1369_v41  ;;  %764 = vmatmul.mubr.bf16.gmra.mxu1 %v1378_v42 }
  0x5a   :  { %1273 = vmatprep.mubr.msk.bf16.mxu0 %vm451_vm0, %v1373_v43  ;;  %1289 = vmatprep.mubr.msk.bf16.mxu1 %vm451_vm0, %v1382_v44 }
  0x61   :  { %644 = vmatmul.mubr.bf16.gmra.mxu0 %v1375_v45  ;;  %772 = vmatmul.mubr.bf16.gmra.mxu1 %v1384_v46 }
  0x62   :  { %1274 = vmatprep.mubr.msk.bf16.mxu0 %vm451_vm0, %v1379_v47  ;;  %1290 = vmatprep.mubr.msk.bf16.mxu1 %vm451_vm0, %v1388_v48  ;;  %v1761_v48 = vld [vmem:[%s2117_s2] ss:$0 sm:$0xff]  ;;  %s1455_s2 = smov [#allocation4]  }
  0x63   :  { %s1180_s21 = sshll.u32 %s1455_s2, 4  ;;  %s1181_s21 = int_to_ptr.vmem [resolvable:$true] %s1180_s21 }
  0x64   :  { %s1430_s22 = scalar_lea.vmem %s1181_s21, 2048  ;;  %p1435_p1 = scmp.lt.s32.totalorder %s1181_s21, %s1181_s21 }
  0x65   :  { %p1431_p0 = scmp.ne.s32.totalorder %s1181_s21, %s1430_s22  ;;  %p1436_p2 = scmp.lt.s32.totalorder %s1430_s22, %s1430_s22 }
  0x67   :  { %p1437_p3 = por %p1436_p2, %p1435_p1 }
  0x69   :  { %652 = vmatmul.mubr.bf16.gmra.mxu0 %v1381_v49  ;;  %780 = vmatmul.mubr.bf16.gmra.mxu1 %v1390_v50  ;;  %p1438_p4 = pnand %p1437_p3, %p1431_p0 }
  0x6a   :  { %1275 = vmatprep.mubr.msk.bf16.mxu0 %vm451_vm0, %v1385_v51  ;;  %1291 = vmatprep.mubr.msk.bf16.mxu1 %vm451_vm0, %v1394_v52 }
  0x71   :  { %660 = vmatmul.mubr.bf16.gmra.mxu0 %v1387_v53  ;;  %788 = vmatmul.mubr.bf16.gmra.mxu1 %v1396_v54 }
  0x72   :  { %1276 = vmatprep.mubr.msk.bf16.mxu0 %vm451_vm0, %v1391_v55  ;;  %1292 = vmatprep.mubr.msk.bf16.mxu1 %vm451_vm0, %v1400_v56 }
  0x79   :  { %668 = vmatmul.mubr.bf16.gmra.mxu0 %v1393_v57  ;;  %796 = vmatmul.mubr.bf16.gmra.mxu1 %v1402_v58 }
  0x7a   :  { %1277 = vmatprep.mubr.msk.bf16.mxu0 %vm451_vm0, %v1397_v59  ;;  %1293 = vmatprep.mubr.msk.bf16.mxu1 %vm451_vm0, %v1406_v60 }
  0x81   :  { %676 = vmatmul.mubr.bf16.gmra.mxu0 %v1399_v61  ;;  %804 = vmatmul.mubr.bf16.gmra.mxu1 %v1408_v62 }
  0x82   :  { %1278 = vmatprep.mubr.msk.bf16.mxu0 %vm451_vm0, %v1403_v63  ;;  %1294 = vmatprep.mubr.msk.bf16.mxu1 %vm451_vm0, %v1412_v0 }
  0x89   :  { %684 = vmatmul.mubr.bf16.gmra.mxu0 %v1405_v1  ;;  %812 = vmatmul.mubr.bf16.gmra.mxu1 %v1414_v2 }
  0x8a   :  { %1279 = vmatprep.mubr.msk.bf16.mxu0 %vm451_vm0, %v1409_v3  ;;  %1295 = vmatprep.mubr.msk.bf16.mxu1 %vm451_vm0, %v1418_v4 }
  0x91   :  { %692 = vmatmul.mubr.bf16.gmra.mxu0 %v1411_v5  ;;  %820 = vmatmul.mubr.bf16.gmra.mxu1 %v1420_v6 }
  0x92   :  { %1280 = vmatprep.mubr.msk.bf16.mxu0 %vm451_vm0, %v1415_v7  ;;  %1296 = vmatprep.mubr.msk.bf16.mxu1 %vm451_vm0, %v1424_v8 }
  0x99   :  { %700 = vmatmul.mubr.bf16.gmra.mxu0 %v1417_v10  ;;  %828 = vmatmul.mubr.bf16.gmra.mxu1 %v1426_v11 }
  0x9a   :  { %1281 = vmatprep.mubr.msk.bf16.mxu0 %vm451_vm0, %v1421_v12  ;;  %1297 = vmatprep.mubr.msk.bf16.mxu1 %vm451_vm0, %v1427_v13 }
  0xa1   :  { %708 = vmatmul.mubr.bf16.gmra.mxu0 %v1423_v14  ;;  %836 = vmatmul.mubr.bf16.gmra.mxu1 %v1429_v15 }
  0xe9   :  { %v589_v16 = vpop.f32.mrf.mxu0  ;;  %v1732_v17 = vpop.f32.mrf.mxu1 }
  0xea   :  { %v590_v63 = vadd.f32 %v1761_v48, %v589_v16 }
  0xeb   :  { %v591_v18 = vpop.f32.mrf.mxu0  ;;  %v719_v19 = vpop.f32.mrf.mxu1 }
  0xec   :  { %v844_v7 = vmax.f32 %v590_v63, 0.0 }
  0xed   :  { %v592_v20 = vpop.f32.mrf.mxu0  ;;  %v1734_v21 = vpop.f32.mrf.mxu1 }
  0xee   :  { %v593_v8 = vadd.f32 %v1761_v48, %v592_v20 }
  0xef   :  { %v594_v22 = vpop.f32.mrf.mxu0  ;;  %v722_v23 = vpop.f32.mrf.mxu1 }
  0xf0   :  { %v845_v19 = vmax.f32 %v593_v8, 0.0 }
  0xf1   :  { %v597_v24 = vpop.f32.mrf.mxu0  ;;  %v1736_v25 = vpop.f32.mrf.mxu1 }
  0xf2   :  { %v598_v22 = vadd.f32 %v1761_v48, %v597_v24 }
  0xf3   :  { %v599_v26 = vpop.f32.mrf.mxu0  ;;  %v727_v27 = vpop.f32.mrf.mxu1 }
  0xf5   :  { %v1738_v28 = vpop.f32.mrf.mxu0  ;;  %v1740_v29 = vpop.f32.mrf.mxu1 }
  0xf7   :  { %v602_v30 = vpop.f32.mrf.mxu0  ;;  %v730_v31 = vpop.f32.mrf.mxu1 }
  0xf9   :  { %v1742_v32 = vpop.f32.mrf.mxu0  ;;  %v1744_v33 = vpop.f32.mrf.mxu1 }
  0xfb   :  { %v607_v34 = vpop.f32.mrf.mxu0  ;;  %v735_v35 = vpop.f32.mrf.mxu1 }
  0xfd   :  { %v1746_v36 = vpop.f32.mrf.mxu0  ;;  %v1748_v37 = vpop.f32.mrf.mxu1 }
  0xff   :  { %v610_v38 = vpop.f32.mrf.mxu0  ;;  %v738_v39 = vpop.f32.mrf.mxu1 }
 0x100   :  { %v846_v39 = vmax.f32 %v598_v22, 0.0 }
 0x101   :  { %v1750_v40 = vpop.f32.mrf.mxu0  ;;  %v1752_v41 = vpop.f32.mrf.mxu1 }
 0x103   :  { %v615_v42 = vpop.f32.mrf.mxu0  ;;  %v743_v43 = vpop.f32.mrf.mxu1 }
 0x104   :  { %v601_v42 = vadd.f32 %v1761_v48, %v1738_v28 }
 0x105   :  { %v1754_v44 = vpop.f32.mrf.mxu0  ;;  %v1756_v45 = vpop.f32.mrf.mxu1 }
 0x107   :  { %v618_v46 = vpop.f32.mrf.mxu0  ;;  %v746_v47 = vpop.f32.mrf.mxu1 }
 0x109   :  { %v621_v49 = vpop.f32.mrf.mxu0  ;;  %v1763_v50 = vpop.f32.mrf.mxu1 }
 0x10a   :  { %v622_v51 = vadd.f32 %v1761_v48, %v621_v49 }
 0x10b   :  { %v623_v52 = vpop.f32.mrf.mxu0  ;;  %v751_v53 = vpop.f32.mrf.mxu1 }
 0x10c   :  { %v852_v54 = vmax.f32 %v622_v51, 0.0 }
 0x10d   :  { %v624_v55 = vpop.f32.mrf.mxu0  ;;  %v1766_v56 = vpop.f32.mrf.mxu1 }
 0x10e   :  { %917 = vst [vmem:[#allocation2 + $0x1] sm:$0xff] %v852_v54  ;;  %v625_v57 = vadd.f32 %v1761_v48, %v624_v55  ;;  %v847_v55 = vmax.f32 %v601_v42, 0.0 }
 0x10f   :  { %v626_v58 = vpop.f32.mrf.mxu0  ;;  %v754_v59 = vpop.f32.mrf.mxu1 }
 0x110   :  { %v853_v60 = vmax.f32 %v625_v57, 0.0  ;;  %v606_v57 = vadd.f32 %v1761_v48, %v1742_v32 }
 0x111   :  { %v629_v61 = vpop.f32.mrf.mxu0  ;;  %v1769_v62 = vpop.f32.mrf.mxu1 }
 0x112   :  { %918 = vst [vmem:[#allocation2 + $0x11] sm:$0xff] %v853_v60  ;;  %v630_v0 = vadd.f32 %v1761_v48, %v629_v61 }
 0x113   :  { %v631_v1 = vpop.f32.mrf.mxu0  ;;  %v759_v2 = vpop.f32.mrf.mxu1 }
 0x114   :  { %v854_v3 = vmax.f32 %v630_v0, 0.0 }
 0x115   :  { %v632_v4 = vpop.f32.mrf.mxu0  ;;  %v1773_v5 = vpop.f32.mrf.mxu1  ;;  %v925_v6 = vld [vmem:[#allocation2] sm:$0xff] }
 0x116   :  { %919 = vst [vmem:[#allocation2 + $0x21] sm:$0xff] %v854_v3  ;;  %v633_v9 = vadd.f32 %v1761_v48, %v632_v4  ;;  %v941_v10 = vmax.f32 %v925_v6, %v852_v54  ;;  %v609_v4 = vadd.f32 %v1761_v48, %v1746_v36 }
 0x117   :  { %v634_v11 = vpop.f32.mrf.mxu0  ;;  %v762_v12 = vpop.f32.mrf.mxu1 }
 0x118   :  { %v855_v13 = vmax.f32 %v633_v9, 0.0  ;;  %v1777_v14 = vmax.f32 %v844_v7, %v941_v10 }
 0x119   :  { %v637_v15 = vpop.f32.mrf.mxu0  ;;  %v1779_v16 = vpop.f32.mrf.mxu1  ;;  %v926_v18 = vld [vmem:[#allocation2 + $0x10] sm:$0xff] }
 0x11a   :  { %920 = vst [vmem:[#allocation2 + $0x31] sm:$0xff] %v855_v13  ;;  %v638_v23 = vadd.f32 %v1761_v48, %v637_v15  ;;  %v942_v20 = vmax.f32 %v926_v18, %v853_v60  ;;  %v849_v15 = vmax.f32 %v609_v4, 0.0  ;;  %v614_v18 = vadd.f32 %v1761_v48, %v1750_v40 }
 0x11b   :  { %v639_v26 = vpop.f32.mrf.mxu0  ;;  %v767_v27 = vpop.f32.mrf.mxu1 }
 0x11c   :  { %v856_v30 = vmax.f32 %v638_v23, 0.0  ;;  %v1783_v31 = vmax.f32 %v845_v19, %v942_v20 }
 0x11d   :  { %v640_v34 = vpop.f32.mrf.mxu0  ;;  %v1785_v35 = vpop.f32.mrf.mxu1  ;;  %v927_v38 = vld [vmem:[#allocation2 + $0x20] sm:$0xff] }
 0x11e   :  { %921 = vst [vmem:[#allocation2 + $0x41] sm:$0xff] %v856_v30  ;;  %v641_v24 = vadd.f32 %v1761_v48, %v640_v34  ;;  %v943_v43 = vmax.f32 %v927_v38, %v854_v3  ;;  %v848_v3 = vmax.f32 %v606_v57, 0.0  ;;  %v617_v34 = vadd.f32 %v1761_v48, %v1754_v44 }
 0x11f   :  { %v642_v46 = vpop.f32.mrf.mxu0  ;;  %v770_v47 = vpop.f32.mrf.mxu1 }
 0x120   :  { %v857_v49 = vmax.f32 %v641_v24, 0.0  ;;  %v1790_v51 = vmax.f32 %v846_v39, %v943_v43  ;;  %v851_v47 = vmax.f32 %v617_v34, 0.0 }
 0x121   :  { %v645_v52 = vpop.f32.mrf.mxu0  ;;  %v1792_v53 = vpop.f32.mrf.mxu1  ;;  %v928_v54 = vld [vmem:[#allocation2 + $0x30] sm:$0xff] }
 0x122   :  { %922 = vst [vmem:[#allocation2 + $0x51] sm:$0xff] %v857_v49  ;;  %v646_v28 = vadd.f32 %v1761_v48, %v645_v52  ;;  %v944_v58 = vmax.f32 %v928_v54, %v855_v13 }
 0x123   :  { %v647_v59 = vpop.f32.mrf.mxu0  ;;  %v775_v60 = vpop.f32.mrf.mxu1 }
 0x124   :  { %v858_v61 = vmax.f32 %v646_v28, 0.0  ;;  %v1797_v63 = vmax.f32 %v847_v55, %v944_v58 }
 0x125   :  { %v648_v0 = vpop.f32.mrf.mxu0  ;;  %v1799_v1 = vpop.f32.mrf.mxu1  ;;  %v929_v2 = vld [vmem:[#allocation2 + $0x40] sm:$0xff] }
 0x126   :  { %923 = vst [vmem:[#allocation2 + $0x61] sm:$0xff] %v858_v61  ;;  %v649_v32 = vadd.f32 %v1761_v48, %v648_v0  ;;  %v945_v6 = vmax.f32 %v929_v2, %v856_v30  ;;  %v850_v30 = vmax.f32 %v614_v18, 0.0 }
 0x127   :  { %v650_v7 = vpop.f32.mrf.mxu0  ;;  %v778_v8 = vpop.f32.mrf.mxu1 }
 0x128   :  { %v859_v9 = vmax.f32 %v649_v32, 0.0  ;;  %v1804_v10 = vmax.f32 %v848_v3, %v945_v6 }
 0x129   :  { %v1806_v11 = vpop.f32.mrf.mxu0  ;;  %v1808_v12 = vpop.f32.mrf.mxu1  ;;  %v930_v13 = vld [vmem:[#allocation2 + $0x50] sm:$0xff] }
 0x12a   :  { %924 = vst [vmem:[#allocation2 + $0x71] sm:$0xff] %v859_v9  ;;  %v946_v36 = vmax.f32 %v930_v13, %v857_v49 }
 0x12b   :  { %v655_v19 = vpop.f32.mrf.mxu0  ;;  %v783_v22 = vpop.f32.mrf.mxu1 }
 0x12c   :  { %v1812_v23 = vmax.f32 %v849_v15, %v946_v36 }
 0x12d   :  { %v1814_v20 = vpop.f32.mrf.mxu0  ;;  %v1816_v26 = vpop.f32.mrf.mxu1  ;;  %v931_v27 = vld [vmem:[#allocation2 + $0x60] sm:$0xff] }
 0x12e   :  { %v947_v38 = vmax.f32 %v931_v27, %v858_v61 }
 0x12f   :  { %v658_v39 = vpop.f32.mrf.mxu0  ;;  %v786_v42 = vpop.f32.mrf.mxu1 }
 0x130   :  { %v1820_v24 = vmax.f32 %v850_v30, %v947_v38 }
 0x131   :  { %v1822_v40 = vpop.f32.mrf.mxu0  ;;  %v1824_v43 = vpop.f32.mrf.mxu1  ;;  %v932_v46 = vld [vmem:[#allocation2 + $0x70] sm:$0xff] }
 0x132   :  { %v948_v49 = vmax.f32 %v932_v46, %v859_v9 }
 0x133   :  { %v663_v52 = vpop.f32.mrf.mxu0  ;;  %v791_v54 = vpop.f32.mrf.mxu1 }
 0x134   :  { %v1826_v55 = vmax.f32 %v851_v47, %v948_v49  ;;  %v1852_v52 = vadd.f32 %v1761_v48, %v1763_v50  ;;  %v1869_v50 = vadd.f32 %v1761_v48, %v1736_v25  ;;  %v1884_v25 = vadd.f32 %v1761_v48, %v1744_v33 }
 0x135   :  { %v1828_v57 = vpop.f32.mrf.mxu0  ;;  %v1830_v28 = vpop.f32.mrf.mxu1 }
 0x137   :  { %v666_v44 = vpop.f32.mrf.mxu0  ;;  %v794_v58 = vpop.f32.mrf.mxu1 }
 0x138   :  { %v1856_v44 = vadd.f32 %v1761_v48, %v1732_v17  ;;  %v1873_v17 = vadd.f32 %v1761_v48, %v1740_v29  ;;  %v657_v29 = vadd.f32 %v1761_v48, %v1814_v20 }
 0x139   :  { %v1832_v59 = vpop.f32.mrf.mxu0  ;;  %v1834_v60 = vpop.f32.mrf.mxu1 }
 0x13b   :  { %v671_v61 = vpop.f32.mrf.mxu0  ;;  %v799_v0 = vpop.f32.mrf.mxu1 }
 0x13c   :  { %v654_v0 = vadd.f32 %v1761_v48, %v1806_v11  ;;  %v884_v11 = vmax.f32 %v1852_v52, 0.0 }
 0x13d   :  { %v1836_v2 = vpop.f32.mrf.mxu0  ;;  %v1838_v3 = vpop.f32.mrf.mxu1 }
 0x13f   :  { %v674_v4 = vpop.f32.mrf.mxu0  ;;  %v802_v32 = vpop.f32.mrf.mxu1 }
 0x140   :  { %v1865_v32 = vadd.f32 %v1761_v48, %v1734_v21 }
 0x141   :  { %v1840_v6 = vpop.f32.mrf.mxu0  ;;  %v1842_v7 = vpop.f32.mrf.mxu1 }
 0x143   :  { %v679_v8 = vpop.f32.mrf.mxu0  ;;  %v807_v9 = vpop.f32.mrf.mxu1 }
 0x145   :  { %v1844_v13 = vpop.f32.mrf.mxu0  ;;  %v1846_v15 = vpop.f32.mrf.mxu1 }
 0x147   :  { %v682_v18 = vpop.f32.mrf.mxu0  ;;  %v810_v36 = vpop.f32.mrf.mxu1 }
 0x148   :  { %v1878_v18 = vadd.f32 %v1761_v48, %v1766_v56 }
 0x149   :  { %v685_v19 = vpop.f32.mrf.mxu0  ;;  %v813_v22 = vpop.f32.mrf.mxu1 }
 0x14a   :  { %v686_v27 = vadd.f32 %v1761_v48, %v685_v19  ;;  %v1891_v56 = vadd.f32 %v1761_v48, %v813_v22  ;;  %v1906_v22 = vadd.f32 %v1761_v48, %v1769_v62 }
 0x14b   :  { %v687_v30 = vpop.f32.mrf.mxu0  ;;  %v815_v34 = vpop.f32.mrf.mxu1 }
 0x14c   :  { %v868_v38 = vmax.f32 %v686_v27, 0.0  ;;  %v860_v34 = vmax.f32 %v654_v0, 0.0 }
 0x14d   :  { %v688_v39 = vpop.f32.mrf.mxu0  ;;  %v816_v42 = vpop.f32.mrf.mxu1 }
 0x14e   :  { %957 = vst [vmem:[#allocation2 + $0x1] sm:$0xff] %v868_v38  ;;  %v689_v46 = vadd.f32 %v1761_v48, %v688_v39 }
 0x14f   :  { %v690_v47 = vpop.f32.mrf.mxu0  ;;  %v818_v49 = vpop.f32.mrf.mxu1 }
 0x150   :  { %v869_v54 = vmax.f32 %v689_v46, 0.0  ;;  %v1901_v49 = vadd.f32 %v1761_v48, %v1748_v37  ;;  %v662_v37 = vadd.f32 %v1761_v48, %v1822_v40  ;;  %v1927_v40 = vadd.f32 %v1761_v48, %v1752_v41 }
 0x151   :  { %v693_v58 = vpop.f32.mrf.mxu0  ;;  %v821_v61 = vpop.f32.mrf.mxu1 }
 0x152   :  { %958 = vst [vmem:[#allocation2 + $0x11] sm:$0xff] %v869_v54  ;;  %v1861_v4 = vadd.f32 %v1761_v48, %v693_v58  ;;  %v2119_v58 = vmax.f32 %v1878_v18, 0.0  ;;  %v862_v41 = vmax.f32 %v662_v37, 0.0  ;;  %v1959_v37 = vadd.f32 %v1761_v48, %v1785_v35 }
 0x153   :  { %v695_v8 = vpop.f32.mrf.mxu0  ;;  %v823_v9 = vpop.f32.mrf.mxu1  ;;  %v782_v35 = vadd.f32 %v1761_v48, %v1808_v12 }
 0x154   :  { %v870_v36 = vmax.f32 %v1861_v4, 0.0  ;;  %v1912_v9 = vadd.f32 %v1761_v48, %v1773_v5  ;;  %v2120_v8 = vmax.f32 %v1906_v22, 0.0 }
 0x155   :  { %v965_v19 = vld [vmem:[#allocation2] sm:$0xff]  ;;  %v696_v27 = vpop.f32.mrf.mxu0  ;;  %v1888_v30 = vpop.f32.mrf.mxu1 }
 0x156   :  { %v981_v39 = vmax.f32 %v965_v19, %v868_v38  ;;  %1046 = vst [vmem:[#allocation2 + $0x1] sm:$0xff] %v884_v11  ;;  %959 = vst [vmem:[#allocation2 + $0x21] sm:$0xff] %v870_v36  ;;  %v1894_v46 = vadd.f32 %v1761_v48, %v696_v27  ;;  %v861_v19 = vmax.f32 %v657_v29, 0.0  ;;  %v1931_v29 = vadd.f32 %v1761_v48, %v1779_v16 }
 0x157   :  { %v698_v52 = vpop.f32.mrf.mxu0  ;;  %v826_v38 = vpop.f32.mrf.mxu1  ;;  %v2122_v33 = vmax.f32 %v1912_v9, 0.0 }
 0x158   :  { %v989_v0 = vmax.f32 %v860_v34, %v981_v39  ;;  %v871_v4 = vmax.f32 %v1894_v46, 0.0 }
 0x159   :  { %v966_v27 = vld [vmem:[#allocation2 + $0x10] sm:$0xff]  ;;  %v701_v52 = vpop.f32.mrf.mxu0  ;;  %v1916_v38 = vpop.f32.mrf.mxu1 }
 0x15a   :  { %v1022_v20 = vmax.f32 %v989_v0, 0.0  ;;  %v982_v62 = vmax.f32 %v966_v27, %v869_v54  ;;  %1047 = vst [vmem:[#allocation2 + $0x11] sm:$0xff] %v2119_v58  ;;  %960 = vst [vmem:[#allocation2 + $0x31] sm:$0xff] %v871_v4  ;;  %v1922_v39 = vadd.f32 %v1761_v48, %v701_v52  ;;  %v1934_v54 = vadd.f32 %v1761_v48, %v816_v42 }
 0x15b   :  { %v703_v46 = vpop.f32.mrf.mxu0  ;;  %v831_v27 = vpop.f32.mrf.mxu1  ;;  %v665_v58 = vadd.f32 %v1761_v48, %v1828_v57  ;;  %v1943_v42 = vadd.f32 %v1761_v48, %v821_v61 }
 0x15c   :  { %v1030_v52 = vmax.f32 %v1777_v14, %v1022_v20  ;;  %v990_v47 = vmax.f32 %v861_v19, %v982_v62  ;;  %v2121_v5 = vmax.f32 %v1922_v39, 0.0  ;;  %v2123_v19 = vmax.f32 %v1891_v56, 0.0 }
 0x15d   :  { %v967_v16 = vld [vmem:[#allocation2 + $0x20] sm:$0xff]  ;;  %v704_v46 = vpop.f32.mrf.mxu0  ;;  %v1945_v27 = vpop.f32.mrf.mxu1 }
 0x15e   :  { %v1054_v21 = vld [vmem:[#allocation2] sm:$0xff]  ;;  %1038 = vst [vmem:[#allocation4] sm:$0xff] %v1030_v52  ;;  %v1023_v34 = vmax.f32 %v989_v0, %v990_v47  ;;  %v983_v14 = vmax.f32 %v967_v16, %v870_v36  ;;  %1048 = vst [vmem:[#allocation2 + $0x21] sm:$0xff] %v2120_v8  ;;  %v1954_v57 = vadd.f32 %v1761_v48, %v704_v46  ;;  %v2124_v16 = vmax.f32 %v1856_v44, 0.0 }
 0x15f   :  { %v1070_v20 = vmax.f32 %v1054_v21, %v884_v11  ;;  %1086 = vst [vmem:[#allocation2 + $0x1] sm:$0xff] %v2123_v19  ;;  %961 = vst [vmem:[#allocation2 + $0x41] sm:$0xff] %v2121_v5  ;;  %v1963_v36 = vadd.f32 %v1761_v48, %v1792_v53  ;;  %v901_v11 = vmax.f32 %v1934_v54, 0.0  ;;  %v706_v21 = vpop.f32.mrf.mxu0  ;;  %v834_v0 = vpop.f32.mrf.mxu1  ;;  %v863_v8 = vmax.f32 %v665_v58, 0.0 }
 0x160   :  { %v1031_v62 = vmax.f32 %v1783_v31, %v1023_v34  ;;  %v991_v52 = vmax.f32 %v862_v41, %v983_v14  ;;  %v873_v19 = vmax.f32 %v1954_v57, 0.0  ;;  %v670_v53 = vadd.f32 %v1761_v48, %v1832_v59 }
 0x161   :  { %v1969_v46 = vmax.f32 %v2124_v16, %v1070_v20  ;;  %v968_v61 = vld [vmem:[#allocation2 + $0x30] sm:$0xff]  ;;  %v902_v21 = vmax.f32 %v1943_v42, 0.0  ;;  %v709_v0 = vpop.f32.mrf.mxu0  ;;  %v1977_v31 = vpop.f32.mrf.mxu1  ;;  %v2125_v41 = vmax.f32 %v1878_v18, 0.0  ;;  %v1996_v18 = vadd.f32 %v1761_v48, %v1888_v30 }
 0x162   :  { %v1055_v5 = vld [vmem:[#allocation2 + $0x10] sm:$0xff]  ;;  %1039 = vst [vmem:[#allocation4 + $0x8] sm:$0xff] %v1031_v62  ;;  %v1024_v44 = vmax.f32 %v990_v47, %v991_v52  ;;  %v984_v34 = vmax.f32 %v968_v61, %v871_v4  ;;  %1049 = vst [vmem:[#allocation2 + $0x31] sm:$0xff] %v2122_v33  ;;  %v1988_v59 = vadd.f32 %v1761_v48, %v709_v0  ;;  %v2126_v62 = vmax.f32 %v1865_v32, 0.0 }
 0x163   :  { %v1071_v12 = vmax.f32 %v1055_v5, %v2125_v41  ;;  %1087 = vst [vmem:[#allocation2 + $0x11] sm:$0xff] %v901_v11  ;;  %962 = vst [vmem:[#allocation2 + $0x51] sm:$0xff] %v873_v19  ;;  %v785_v4 = vadd.f32 %v1761_v48, %v1816_v26  ;;  %v711_v5 = vpop.f32.mrf.mxu0  ;;  %v839_v14 = vpop.f32.mrf.mxu1  ;;  %v892_v41 = vmax.f32 %v782_v35, 0.0  ;;  %v864_v47 = vmax.f32 %v670_v53, 0.0 }
 0x164   :  { %v1032_v20 = vmax.f32 %v1790_v51, %v1024_v44  ;;  %v992_v61 = vmax.f32 %v863_v8, %v984_v34  ;;  %v874_v0 = vmax.f32 %v1988_v59, 0.0  ;;  %v673_v26 = vadd.f32 %v1761_v48, %v1836_v2 }
 0x165   :  { %v2001_v16 = vmax.f32 %v2126_v62, %v1071_v12  ;;  %v1056_v30 = vld [vmem:[#allocation2 + $0x20] sm:$0xff]  ;;  %v2008_v5 = vadd.f32 %v1761_v48, %v1916_v38  ;;  %v712_v51 = vpop.f32.mrf.mxu0  ;;  %v2010_v8 = vpop.f32.mrf.mxu1  ;;  %v2127_v32 = vmax.f32 %v1891_v56, 0.0  ;;  %v2128_v35 = vmax.f32 %v1922_v39, 0.0 }
 0x166   :  { %v1094_v33 = vld [vmem:[#allocation2] sm:$0xff]  ;;  %1040 = vst [vmem:[#allocation4 + $0x10] sm:$0xff] %v1032_v20  ;;  %v1025_v34 = vmax.f32 %v991_v52, %v992_v61  ;;  %v2129_v2 = vmax.f32 %v1931_v29, 0.0  ;;  %v2130_v12 = vmax.f32 %v1906_v22, 0.0  ;;  %1088 = vst [vmem:[#allocation2 + $0x21] sm:$0xff] %v902_v21  ;;  %v893_v38 = vmax.f32 %v785_v4, 0.0 }
 0x167   :  { %v969_v58 = vld [vmem:[#allocation2 + $0x40] sm:$0xff]  ;;  %v1110_v44 = vmax.f32 %v1094_v33, %v2127_v32  ;;  %963 = vst [vmem:[#allocation2 + $0x61] sm:$0xff] %v874_v0  ;;  %v790_v56 = vadd.f32 %v1761_v48, %v1824_v43  ;;  %v903_v33 = vmax.f32 %v1996_v18, 0.0  ;;  %v2028_v39 = vadd.f32 %v1761_v48, %v712_v51  ;;  %v714_v52 = vpop.f32.mrf.mxu0 }
 0x168   :  { %v985_v53 = vmax.f32 %v969_v58, %v2128_v35  ;;  %1050 = vst [vmem:[#allocation2 + $0x41] sm:$0xff] %v2129_v2  ;;  %v1072_v14 = vmax.f32 %v1056_v30, %v2130_v12  ;;  %v842_v58 = vpop.f32.mrf.mxu1  ;;  %v1033_v22 = vmax.f32 %v1797_v63, %v1025_v34  ;;  %v2131_v30 = vmax.f32 %v1869_v50, 0.0 }
 0x169   :  { %v1118_v20 = vmax.f32 %v892_v41, %v1110_v44  ;;  %v865_v35 = vmax.f32 %v673_v26, 0.0  ;;  %v678_v4 = vadd.f32 %v1761_v48, %v1840_v6  ;;  %v1057_v12 = vld [vmem:[#allocation2 + $0x30] sm:$0xff]  ;;  %v904_v51 = vmax.f32 %v2008_v5, 0.0 }
 0x16a   :  { %v993_v62 = vmax.f32 %v864_v47, %v985_v53  ;;  %v2033_v32 = vmax.f32 %v2131_v30, %v1072_v14  ;;  %v1095_v43 = vld [vmem:[#allocation2 + $0x10] sm:$0xff]  ;;  %v875_v52 = vmax.f32 %v2028_v39, 0.0  ;;  %1041 = vst [vmem:[#allocation4 + $0x18] sm:$0xff] %v1033_v22  ;;  %v2132_v41 = vmax.f32 %v1959_v37, 0.0  ;;  %1089 = vst [vmem:[#allocation2 + $0x31] sm:$0xff] %v903_v33 }
 0x16b   :  { %v970_v2 = vld [vmem:[#allocation2 + $0x50] sm:$0xff]  ;;  %v1150_v58 = vmax.f32 %v1118_v20, 0.0  ;;  %v1111_v63 = vmax.f32 %v1095_v43, %v901_v11  ;;  %v2049_v6 = vadd.f32 %v1761_v48, %v1799_v1  ;;  %v894_v26 = vmax.f32 %v790_v56, 0.0 }
 0x16c   :  { %v1026_v47 = vmax.f32 %v992_v61, %v993_v62  ;;  %v986_v50 = vmax.f32 %v970_v2, %v873_v19  ;;  %1051 = vst [vmem:[#allocation2 + $0x51] sm:$0xff] %v2132_v41  ;;  %v2133_v44 = vmax.f32 %v1912_v9, 0.0  ;;  %964 = vst [vmem:[#allocation2 + $0x71] sm:$0xff] %v875_v52  ;;  %v2055_v54 = vadd.f32 %v1761_v48, %v1945_v27 }
 0x16d   :  { %v1158_v57 = vmax.f32 %v1969_v46, %v1150_v58  ;;  %v1119_v11 = vmax.f32 %v893_v38, %v1111_v63  ;;  %v793_v53 = vadd.f32 %v1761_v48, %v1830_v28  ;;  %v866_v1 = vmax.f32 %v678_v4, 0.0  ;;  %v1096_v14 = vld [vmem:[#allocation2 + $0x20] sm:$0xff] }
 0x16e   :  { %v1073_v34 = vmax.f32 %v1057_v12, %v2133_v44  ;;  %v1034_v19 = vmax.f32 %v1804_v10, %v1026_v47  ;;  %v994_v61 = vmax.f32 %v865_v35, %v986_v50  ;;  %v2134_v56 = vmax.f32 %v1873_v17, 0.0  ;;  %v971_v39 = vld [vmem:[#allocation2 + $0x60] sm:$0xff] }
 0x16f   :  { %v1058_v22 = vld [vmem:[#allocation2 + $0x40] sm:$0xff]  ;;  %v2065_v27 = vadd.f32 %v1761_v48, %v1977_v31  ;;  %1167 = vst [vmem:[#allocation4 + $0x40] sm:$0xff] %v1158_v57  ;;  %v1151_v46 = vmax.f32 %v1118_v20, %v1119_v11  ;;  %v1112_v10 = vmax.f32 %v1096_v14, %v902_v21  ;;  %v987_v28 = vmax.f32 %v971_v39, %v874_v0 }
 0x170   :  { %v1081_v9 = vmax.f32 %v2134_v56, %v1073_v34  ;;  %1042 = vst [vmem:[#allocation4 + $0x20] sm:$0xff] %v1034_v19  ;;  %v1027_v38 = vmax.f32 %v993_v62, %v994_v61  ;;  %v2135_v30 = vmax.f32 %v1963_v36, 0.0  ;;  %1090 = vst [vmem:[#allocation2 + $0x41] sm:$0xff] %v904_v51  ;;  %v891_v17 = vmax.f32 %v2049_v6, 0.0 }
 0x171   :  { %v681_v31 = vadd.f32 %v1761_v48, %v1844_v13  ;;  %v2136_v20 = vmax.f32 %v1931_v29, 0.0  ;;  %v905_v42 = vmax.f32 %v2055_v54, 0.0  ;;  %v1159_v21 = vmax.f32 %v2001_v16, %v1151_v46  ;;  %v1097_v2 = vld [vmem:[#allocation2 + $0x30] sm:$0xff] }
 0x172   :  { %1052 = vst [vmem:[#allocation2 + $0x61] sm:$0xff] %v2135_v30  ;;  %v1120_v59 = vmax.f32 %v894_v26, %v1112_v10  ;;  %v1035_v0 = vmax.f32 %v1812_v23, %v1027_v38  ;;  %v995_v62 = vmax.f32 %v866_v1, %v987_v28  ;;  %v895_v4 = vmax.f32 %v793_v53, 0.0 }
 0x173   :  { %v1074_v35 = vmax.f32 %v1058_v22, %v2136_v20  ;;  %v798_v43 = vadd.f32 %v1761_v48, %v1834_v60  ;;  %v2137_v12 = vmax.f32 %v1884_v25, 0.0  ;;  %v1059_v13 = vld [vmem:[#allocation2 + $0x50] sm:$0xff]  ;;  %v906_v29 = vmax.f32 %v2065_v27, 0.0  ;;  %1168 = vst [vmem:[#allocation4 + $0x48] sm:$0xff] %v1159_v21 }
 0x174   :  { %v1152_v63 = vmax.f32 %v1119_v11, %v1120_v59  ;;  %1043 = vst [vmem:[#allocation4 + $0x28] sm:$0xff] %v1035_v0  ;;  %v1113_v16 = vmax.f32 %v1097_v2, %v903_v33  ;;  %v1028_v47 = vmax.f32 %v994_v61, %v995_v62  ;;  %v972_v23 = vld [vmem:[#allocation2 + $0x70] sm:$0xff]  ;;  %v2138_v50 = vmov %v2132_v41  ;;  %1091 = vst [vmem:[#allocation2 + $0x51] sm:$0xff] %v905_v42 }
 0x175   :  { %v1082_v58 = vmax.f32 %v2137_v12, %v1074_v35  ;;  %v1075_v41 = vmax.f32 %v1059_v13, %v2138_v50  ;;  %v867_v60 = vmax.f32 %v681_v31, 0.0  ;;  %v988_v6 = vmax.f32 %v972_v23, %v875_v52  ;;  %1053 = vst [vmem:[#allocation2 + $0x71] sm:$0xff] %v891_v17 }
 0x176   :  { %v1160_v25 = vmax.f32 %v2033_v32, %v1152_v63  ;;  %v1121_v26 = vmax.f32 %v895_v4, %v1113_v16  ;;  %v1036_v44 = vmax.f32 %v1820_v24, %v1028_v47  ;;  %v2139_v34 = vmax.f32 %v1901_v49, 0.0 }
 0x177   :  { %v882_v18 = vmax.f32 %v1927_v40, 0.0  ;;  %v896_v33 = vmax.f32 %v798_v43, 0.0  ;;  %v1098_v57 = vld [vmem:[#allocation2 + $0x40] sm:$0xff]  ;;  %v996_v11 = vmax.f32 %v867_v60, %v988_v6  ;;  %v841_v37 = vadd.f32 %v1761_v48, %v2010_v8 }
 0x178   :  { %v1083_v54 = vmax.f32 %v2139_v34, %v1075_v41  ;;  %v801_v52 = vadd.f32 %v1761_v48, %v1838_v3  ;;  %1169 = vst [vmem:[#allocation4 + $0x50] sm:$0xff] %v1160_v25  ;;  %v1153_v32 = vmax.f32 %v1120_v59, %v1121_v26  ;;  %1044 = vst [vmem:[#allocation4 + $0x30] sm:$0xff] %v1036_v44  ;;  %v2140_v49 = vmov %v2135_v30 }
 0x179   :  { %v1060_v19 = vld [vmem:[#allocation2 + $0x60] sm:$0xff]  ;;  %v1114_v24 = vmax.f32 %v1098_v57, %v904_v51  ;;  %v745_v40 = vadd.f32 %v1761_v48, %v1756_v45  ;;  %v1029_v53 = vmax.f32 %v995_v62, %v996_v11  ;;  %v907_v39 = vmax.f32 %v841_v37, 0.0 }
 0x17a   :  { %v1076_v61 = vmax.f32 %v1060_v19, %v2140_v49  ;;  %1092 = vst [vmem:[#allocation2 + $0x61] sm:$0xff] %v906_v29  ;;  %v1161_v1 = vmax.f32 %v1081_v9, %v1153_v32  ;;  %v897_v22 = vmax.f32 %v801_v52, 0.0  ;;  %v806_v5 = vadd.f32 %v1761_v48, %v1842_v7 }
 0x17b   :  { %v1122_v14 = vmax.f32 %v896_v33, %v1114_v24  ;;  %v1037_v56 = vmax.f32 %v1826_v55, %v1029_v53  ;;  %v1099_v3 = vld [vmem:[#allocation2 + $0x50] sm:$0xff]  ;;  %v883_v46 = vmax.f32 %v745_v40, 0.0  ;;  %v809_v20 = vadd.f32 %v1761_v48, %v1846_v15 }
 0x17c   :  { %v1084_v8 = vmax.f32 %v882_v18, %v1076_v61  ;;  %1170 = vst [vmem:[#allocation4 + $0x58] sm:$0xff] %v1161_v1  ;;  %v1115_v36 = vmax.f32 %v1099_v3, %v905_v42  ;;  %v1061_v27 = vld [vmem:[#allocation2 + $0x70] sm:$0xff]  ;;  %v898_v30 = vmax.f32 %v806_v5, 0.0 }
 0x17d   :  { %v1154_v51 = vmax.f32 %v1121_v26, %v1122_v14  ;;  %1045 = vst [vmem:[#allocation4 + $0x38] sm:$0xff] %v1037_v56  ;;  %v1077_v10 = vmax.f32 %v1061_v27, %v891_v17  ;;  %1093 = vst [vmem:[#allocation2 + $0x71] sm:$0xff] %v907_v39  ;;  %v899_v59 = vmax.f32 %v809_v20, 0.0 }
 0x17e   :  { %v1123_v9 = vmax.f32 %v897_v22, %v1115_v36 }
 0x17f   :  { %v1162_v45 = vmax.f32 %v1082_v58, %v1154_v51  ;;  %v1085_v28 = vmax.f32 %v883_v46, %v1077_v10 }
 0x180   :  { %v1155_v55 = vmax.f32 %v1122_v14, %v1123_v9 }
 0x181   :  { %v1100_v38 = vld [vmem:[#allocation2 + $0x60] sm:$0xff]  ;;  %1171 = vst [vmem:[#allocation4 + $0x60] sm:$0xff] %v1162_v45 }
 0x182   :  { %v1116_v31 = vmax.f32 %v1100_v38, %v906_v29  ;;  %v1163_v7 = vmax.f32 %v1083_v54, %v1155_v55 }
 0x184   :  { %v1124_v35 = vmax.f32 %v898_v30, %v1116_v31  ;;  %1172 = vst [vmem:[#allocation4 + $0x68] sm:$0xff] %v1163_v7  ;;  %v1101_v21 = vld [vmem:[#allocation2 + $0x70] sm:$0xff] }
 0x185   :  { %v1117_v0 = vmax.f32 %v1101_v21, %v907_v39 }
 0x186   :  { %v1156_v42 = vmax.f32 %v1123_v9, %v1124_v35 }
 0x187   :  { %v1125_v62 = vmax.f32 %v899_v59, %v1117_v0 }
 0x188   :  { %v1164_v17 = vmax.f32 %v1084_v8, %v1156_v42 }
 0x189   :  { %v1157_v4 = vmax.f32 %v1124_v35, %v1125_v62 }
 0x18a   :  { %1173 = vst [vmem:[#allocation4 + $0x70] sm:$0xff] %v1164_v17 }
 0x18b   :  { %v1165_v43 = vmax.f32 %v1085_v28, %v1157_v4 }
 0x18d   :  { %1174 = vst [vmem:[#allocation4 + $0x78] sm:$0xff] %v1165_v43 }
 0x18e   :  { %1441 = shalt.err (!%p1438_p4)
}
 0x18f   :  { %s1456_s23 = smov 128   ;;  %s1457_s24 = smov 8  }
 0x190   :  { %1186 = dma.vmem_to_hbm [thread:$0]  %s1181_s21, 2048, %s2118_s3, [#allocation5], %s1456_s23, %s1456_s23, %s1457_s24  }
 0x191   :  { %1450 = dma.done.wait [#allocation5], 2048  }
 0x192   :  { %1451 = vsyncadd [#allocation5], 4294965248 }
 0x193   :  { %1190 = vsyncpa [#allocation5], 1 }

</bundles_post_ra>
